<compile_context>
chip_gen: v7x
topology: tpu7x:2x2x1
jax: 0.10.0
libtpu: 0.0.40
codegen_flags: <defaults>
</compile_context>

<pallas_src>
import functools

import jax
import jax.numpy as jnp
from jax.experimental import pallas as pl
from jax.experimental.pallas import tpu as pltpu

_MiB = 1024 * 1024
_MIN_TILE = 512          # minimum HW tile (lanes) for the tiled path
_NEG_BIG = -1e30         # softmax mask value for padded columns


def _clamp(v, lo, hi):
    return max(lo, min(v, hi))


def _vmem_capacity_bytes():
    """Physical VMEM of the current TPU generation (conservative fallback)."""
    try:
        return int(pltpu.get_tpu_info().vmem_capacity_bytes)
    except Exception:
        return 64 * _MiB     # v7x-sized fallback: always safe


def _mask_cols(a, tile_idx, hw_tile, valid_hw):
    """Mask (to a huge negative) columns whose global HW index >= valid_hw."""
    if valid_hw is None:
        return a
    col = jax.lax.broadcasted_iota(jnp.int32, a.shape, 1) + tile_idx * hw_tile
    return jnp.where(col < valid_hw, a, _NEG_BIG)


# ----------------------------------------------------------------------------
# Kernels
# ----------------------------------------------------------------------------
def _ext_attn_kernel_single(x_ref, wk_ref, wv_ref, o_ref, *, compute_dtype):
    # x_ref:  (1, N, HW)  one batch, channel-major (native NCHW layout)
    # wk_ref: (S, N)      mk.weight (compute_dtype)
    # wv_ref: (N, S)      mv.weight (compute_dtype)
    # o_ref:  (1, N, HW)
    x = x_ref[0].astype(compute_dtype)                                 # (N, HW)

    # attn^T = Wk @ X  -> (S, HW); f32 accumulate on the MXU.
    a = jnp.dot(wk_ref[...], x, preferred_element_type=jnp.float32)

    # softmax over the HW (lane) axis, all in f32.
    a = a - jnp.max(a, axis=1, keepdims=True)
    e = jnp.exp(a)
    p = e * pl.reciprocal(jnp.sum(e, axis=1, keepdims=True), approx=True)

    # out^T = Wv @ P^T -> (N, HW); lane-dense store.
    out = jnp.dot(wv_ref[...], p.astype(compute_dtype),
                  preferred_element_type=jnp.float32)
    o_ref[0] = out.astype(o_ref.dtype)


def _ext_attn_kernel_tiled_cached(x_ref, wk_ref, wv_ref, o_ref,
                                  a_sc, m_sc, l_sc, *,
                                  compute_dtype, hw_tile, valid_hw):
    # grid = (B, 2, nt)
    #   pass 0: A^T tile = Wk @ X tile, cache it in VMEM, update running
    #           per-s max / exp-sum across the HW tiles.
    #   pass 1: read the cached A^T tile, normalize, matmul with Wv, store.
    # X is only touched during pass 0 (the x BlockSpec is parked in pass 1).
    pass_idx = pl.program_id(1)
    tile_idx = pl.program_id(2)

    @pl.when(pass_idx == 0)
    def _stats_pass():
        @pl.when(tile_idx == 0)
        def _init():
            m_sc[...] = jnp.full_like(m_sc, -jnp.inf)
            l_sc[...] = jnp.zeros_like(l_sc)

        x = x_ref[0].astype(compute_dtype)                             # (N, T)
        a = jnp.dot(wk_ref[...], x, preferred_element_type=jnp.float32)
        a = _mask_cols(a, tile_idx, hw_tile, valid_hw)                 # (S, T)
        a_sc[tile_idx] = a                        # cache A^T tile for pass 1

        m_prev = m_sc[...]
        m_new = jnp.maximum(m_prev, jnp.max(a, axis=1, keepdims=True))
        l_sc[...] = (jnp.exp(m_prev - m_new) * l_sc[...]
                     + jnp.sum(jnp.exp(a - m_new), axis=1, keepdims=True))
        m_sc[...] = m_new

    @pl.when(pass_idx == 1)
    def _output_pass():
        a = a_sc[tile_idx]                                             # (S, T)
        p = jnp.exp(a - m_sc[...]) * pl.reciprocal(l_sc[...], approx=True)
        out = jnp.dot(wv_ref[...], p.astype(compute_dtype),
                      preferred_element_type=jnp.float32)              # (N, T)
        o_ref[0] = out.astype(o_ref.dtype)


def _ext_attn_kernel_tiled_recompute(x_ref, wk_ref, wv_ref, o_ref,
                                     m_sc, l_sc, *,
                                     compute_dtype, hw_tile, valid_hw):
    # Fallback for very large HW where the full S x HW_pad A^T scratch does
    # not fit VMEM: recompute Wk @ X in pass 1 (reads X from HBM twice).
    pass_idx = pl.program_id(1)
    tile_idx = pl.program_id(2)

    x = x_ref[0].astype(compute_dtype)                                 # (N, T)
    a = jnp.dot(wk_ref[...], x, preferred_element_type=jnp.float32)    # (S, T)
    a = _mask_cols(a, tile_idx, hw_tile, valid_hw)

    @pl.when(pass_idx == 0)
    def _stats_pass():
        @pl.when(tile_idx == 0)
        def _init():
            m_sc[...] = jnp.full_like(m_sc, -jnp.inf)
            l_sc[...] = jnp.zeros_like(l_sc)

        m_prev = m_sc[...]
        m_new = jnp.maximum(m_prev, jnp.max(a, axis=1, keepdims=True))
        l_sc[...] = (jnp.exp(m_prev - m_new) * l_sc[...]
                     + jnp.sum(jnp.exp(a - m_new), axis=1, keepdims=True))
        m_sc[...] = m_new

    @pl.when(pass_idx == 1)
    def _output_pass():
        p = jnp.exp(a - m_sc[...]) * pl.reciprocal(l_sc[...], approx=True)
        out = jnp.dot(wv_ref[...], p.astype(compute_dtype),
                      preferred_element_type=jnp.float32)              # (N, T)
        o_ref[0] = out.astype(o_ref.dtype)


# ----------------------------------------------------------------------------
# Wrapper
# ----------------------------------------------------------------------------
def external_attention(x, wk, wv, *, compute_dtype=jnp.bfloat16, hw_tile=None):
    """External attention forward pass.

    x:  (B, N, H, W)   activations (pass bf16 end-to-end if the surrounding
                       model tolerates it — the kernel preserves x.dtype and
                       casts internally; do NOT add a wrapper-side cast).
    wk: (S, N)         mk.weight of nn.Linear(N, S, bias=False)
    wv: (N, S)         mv.weight of nn.Linear(S, N, bias=False)
    """
    B, N, H, W = x.shape
    HW = H * W
    S = wk.shape[0]

    x_flat = x.reshape(B, N, HW)          # free: contiguous view, no transpose
    wk_c = wk.astype(compute_dtype)       # (S, N), tiny
    wv_c = wv.astype(compute_dtype)       # (N, S), tiny

    in_isz = jnp.dtype(x.dtype).itemsize
    c_isz = jnp.dtype(compute_dtype).itemsize
    w_bytes = 2 * 2 * S * N * c_isz       # both weights, double-buffered

    # ---- generation-aware VMEM budgets --------------------------------------
    vmem_cap = _vmem_capacity_bytes()
    big_vmem = vmem_cap >= 96 * _MiB                 # v5e / v6e: 128 MiB parts
    vmem_hard_cap = int(min(vmem_cap * 0.85, vmem_cap - 8 * _MiB))
    single_threshold = (88 if big_vmem else 22) * _MiB
    tile_budget = (28 if big_vmem else 12) * _MiB

    def _tile_bytes(t):
        # double-buffered x + out blocks, plus in-kernel temporaries.
        blk = N * t * in_isz
        temps = N * t * (c_isz + 4) + S * t * (8 + c_isz)
        return 4 * blk + temps

    single_est = _tile_bytes(HW) + w_bytes

    # ---- auto-tiler ----------------------------------------------------------
    if hw_tile is None and single_est > single_threshold and HW >= 2 * _MIN_TILE:
        # Largest multiple-of-512 tile within the per-tile VMEM budget.
        max_t = (HW // _MIN_TILE) * _MIN_TILE
        best = _MIN_TILE
        t = _MIN_TILE
        while t <= max_t:
            if _tile_bytes(t) <= tile_budget:
                best = t
            t += _MIN_TILE
        hw_tile = best
        # Prefer an exact divisor of HW (avoids a padding copy of X).
        for d in range(best, _MIN_TILE - 1, -_MIN_TILE):
            if HW % d == 0:
                hw_tile = d
                break

    # ---- single block per batch ----------------------------------------------
    if hw_tile is None:
        flops = 4 * B * HW * N * S                    # two matmuls
        cost = pl.CostEstimate(
            flops=flops, transcendentals=B * HW * S,
            bytes_accessed=2 * B * N * HW * in_isz + w_bytes)
        vmem_limit = _clamp(int(single_est * 1.4), 32 * _MiB, vmem_hard_cap)
        # TODO(synk): when B == 1 on v7x (2 TensorCores) only the batch axis is
        # parallel so one core idles; a core_map split of the pass-1 HW range
        # with softmax stats shared via CMEM would recover up to 2x there.
        out = pl.pallas_call(
            functools.partial(_ext_attn_kernel_single,
                              compute_dtype=compute_dtype),
            out_shape=jax.ShapeDtypeStruct((B, N, HW), x.dtype),
            grid=(B,),
            in_specs=[
                pl.BlockSpec((1, N, HW), lambda b: (b, 0, 0)),
                pl.BlockSpec((S, N), lambda b: (0, 0)),   # constant weights
                pl.BlockSpec((N, S), lambda b: (0, 0)),
            ],
            out_specs=pl.BlockSpec((1, N, HW), lambda b: (b, 0, 0)),
            compiler_params=pltpu.CompilerParams(
                dimension_semantics=("parallel",),
                vmem_limit_bytes=vmem_limit),
            cost_estimate=cost,
        )(x_flat, wk_c, wv_c)
        return out.reshape(B, N, H, W)

    # ---- HW-tiled two-pass softmax path ---------------------------------------
    assert hw_tile % 128 == 0 and (hw_tile >= _MIN_TILE or hw_tile >= HW), (
        "hw_tile must be a multiple of 128 and at least 512 lanes "
        "(or cover all of H*W)")
    nt = -(-HW // hw_tile)
    HW_pad = nt * hw_tile
    valid_hw = None
    x_in = x_flat
    if HW_pad != HW:
        # No suitable divisor tile: pad HW and mask the padded columns inside
        # the kernel (one extra HBM pass over X; only hit for awkward shapes).
        x_in = jnp.pad(x_flat, ((0, 0), (0, 0), (0, HW_pad - HW)))
        valid_hw = HW

    a_bytes = S * HW_pad * 4                       # cached A^T scratch (f32)
    cached_total = _tile_bytes(hw_tile) + a_bytes + w_bytes
    use_cached = cached_total + 6 * _MiB <= vmem_hard_cap

    if use_cached:
        kernel = functools.partial(_ext_attn_kernel_tiled_cached,
                                   compute_dtype=compute_dtype,
                                   hw_tile=hw_tile, valid_hw=valid_hw)
        scratch = [pltpu.VMEM((nt, S, hw_tile), jnp.float32),   # cached A^T
                   pltpu.VMEM((S, 1), jnp.float32),             # running max
                   pltpu.VMEM((S, 1), jnp.float32)]             # running exp-sum
        # X is only read during pass 0; park its block at the last tile during
        # pass 1 so it is never re-DMA'd from HBM.
        x_index = lambda b, p, t: (b, 0, t * (1 - p) + (nt - 1) * p)
        total_est = cached_total
        x_reads, mm_passes = 1, 2
    else:
        kernel = functools.partial(_ext_attn_kernel_tiled_recompute,
                                   compute_dtype=compute_dtype,
                                   hw_tile=hw_tile, valid_hw=valid_hw)
        scratch = [pltpu.VMEM((S, 1), jnp.float32),
                   pltpu.VMEM((S, 1), jnp.float32)]
        x_index = lambda b, p, t: (b, 0, t)
        total_est = _tile_bytes(hw_tile) + w_bytes
        x_reads, mm_passes = 2, 3

    cost = pl.CostEstimate(
        flops=2 * mm_passes * B * HW_pad * N * S,
        transcendentals=2 * B * HW_pad * S,
        bytes_accessed=(x_reads + 1) * B * N * HW_pad * in_isz + w_bytes)

    # Deeper input pipelining for short per-tile compute, if headroom allows.
    x_spec = pl.BlockSpec((1, N, hw_tile), x_index)
    if (hw_tile <= 1024 and hasattr(pl, "Buffered")
            and total_est + N * hw_tile * in_isz + 8 * _MiB <= vmem_hard_cap):
        try:
            x_spec = pl.BlockSpec((1, N, hw_tile), x_index,
                                  pipeline_mode=pl.Buffered(3))
            total_est += N * hw_tile * in_isz
        except TypeError:
            x_spec = pl.BlockSpec((1, N, hw_tile), x_index)

    vmem_limit = _clamp(int(total_est * 1.3), 32 * _MiB, vmem_hard_cap)

    out = pl.pallas_call(
        kernel,
        out_shape=jax.ShapeDtypeStruct((B, N, HW_pad), x.dtype),
        grid=(B, 2, nt),
        in_specs=[
            x_spec,
            pl.BlockSpec((S, N), lambda b, p, t: (0, 0)),
            pl.BlockSpec((N, S), lambda b, p, t: (0, 0)),
        ],
        # Pass 0 never writes o_ref, so its block is parked at tile 0; pass 1
        # then writes every tile exactly once and all visits to a given output
        # block are consecutive in the (B, 2, nt) iteration order.  NOTE: this
        # is only correct while the pass/tile axes stay "arbitrary"
        # (sequential); do not parallelize or reorder them.
        out_specs=pl.BlockSpec((1, N, hw_tile), lambda b, p, t: (b, 0, t * p)),
        scratch_shapes=scratch,
        compiler_params=pltpu.CompilerParams(
            dimension_semantics=("parallel", "arbitrary", "arbitrary"),
            vmem_limit_bytes=vmem_limit),
        cost_estimate=cost,
    )(x_in, wk_c, wv_c)

    if HW_pad != HW:
        out = out[:, :, :HW]
    return out.reshape(B, N, H, W)


# ----------------------------------------------------------------------------
# Pure-JAX reference (mirrors the PyTorch module exactly)
# ----------------------------------------------------------------------------
def _reference(x, wk, wv):
    B, N, H, W = x.shape
    xt = jnp.transpose(x.reshape(B, N, H * W), (0, 2, 1))   # (B, HW, N)
    attn = jnp.einsum("bln,sn->bls", xt, wk)                # (B, HW, S)
    attn = jax.nn.softmax(attn, axis=1)                     # softmax over HW
    out = jnp.einsum("bls,ns->bln", attn, wv)               # (B, HW, N)
    return jnp.transpose(out, (0, 2, 1)).reshape(B, N, H, W)


if __name__ == "__main__":
    key = jax.random.PRNGKey(0)
    kx, kk, kv, kx2, kx3 = jax.random.split(key, 5)

    # --- default small shape -> single-block path ---------------------------
    B, N, H, W, S = 2, 4, 16, 16, 64
    x = jax.random.normal(kx, (B, N, H, W), dtype=jnp.float32)
    wk = jax.random.normal(kk, (S, N), dtype=jnp.float32) * 0.1   # mk.weight
    wv = jax.random.normal(kv, (N, S), dtype=jnp.float32) * 0.1   # mv.weight

    ref = _reference(x, wk, wv)
    out = jax.block_until_ready(external_attention(x, wk, wv))
    assert out.shape == (B, N, H, W)
    assert jnp.allclose(out, ref, rtol=2e-2, atol=2e-3), "single-block mismatch"

    # Full-f32 compute path (numerics sanity check).
    out_f = jax.block_until_ready(
        external_attention(x, wk, wv, compute_dtype=jnp.float32))
    assert jnp.allclose(out_f, ref, rtol=1e-2, atol=1e-3), "f32 path mismatch"

    # --- HW-tiled two-pass path with cached A^T (HW = 1024, 512-lane tiles) --
    x2 = jax.random.normal(kx2, (1, 4, 32, 32), dtype=jnp.float32)
    ref2 = _reference(x2, wk, wv)
    out2 = jax.block_until_ready(external_attention(x2, wk, wv, hw_tile=512))
    assert jnp.allclose(out2, ref2, rtol=2e-2, atol=2e-3), "tiled path mismatch"

    # --- tiled path where HW (=576) is not a tile multiple: pad + mask -------
    x3 = jax.random.normal(kx3, (1, 4, 24, 24), dtype=jnp.float32)
    ref3 = _reference(x3, wk, wv)
    out3 = jax.block_until_ready(external_attention(x3, wk, wv, hw_tile=512))
    assert jnp.allclose(out3, ref3, rtol=2e-2, atol=2e-3), "padded tiled mismatch"

    print("KERNEL_OK")
</pallas_src>

<mosaic_0001>
module attributes {stable_mosaic.version = 11 : i64} {
  func.func @_ext_attn_kernel_single(%arg0: i32, %arg1: memref<1x4x256xf32, #tpu.memory_space<vmem>>, %arg2: memref<64x4xbf16, #tpu.memory_space<vmem>>, %arg3: memref<4x64xbf16, #tpu.memory_space<vmem>>, %arg4: memref<1x4x256xf32, #tpu.memory_space<vmem>>) attributes {dimension_semantics = [#tpu.dimension_semantics<parallel>], iteration_bounds = array<i64: 2>, scalar_prefetch = 0 : i64, scratch_operands = 0 : i64, tpu.core_type = #tpu.core_type<tc>, window_params = [{transform_indices = @transform_0, window_bounds = array<i64: 1, 4, 256>}, {pipeline_mode = #tpu.pipeline_mode<synchronous>, transform_indices = @transform_1, window_bounds = array<i64: 64, 4>}, {pipeline_mode = #tpu.pipeline_mode<synchronous>, transform_indices = @transform_2, window_bounds = array<i64: 4, 64>}, {transform_indices = @transform_3, window_bounds = array<i64: 1, 4, 256>}]} {
    %c0 = arith.constant 0 : index
    %c0_0 = arith.constant 0 : index
    %c0_1 = arith.constant 0 : index
    %0 = vector.load %arg1[%c0, %c0_0, %c0_1] : memref<1x4x256xf32, #tpu.memory_space<vmem>>, vector<1x4x256xf32>
    %1 = vector.shape_cast %0 : vector<1x4x256xf32> to vector<4x256xf32>
    %2 = arith.truncf %1 : vector<4x256xf32> to vector<4x256xbf16>
    %c0_2 = arith.constant 0 : index
    %c0_3 = arith.constant 0 : index
    %3 = vector.load %arg2[%c0_2, %c0_3] : memref<64x4xbf16, #tpu.memory_space<vmem>>, vector<64x4xbf16>
    %cst = arith.constant dense<0.000000e+00> : vector<64x256xf32>
    %4 = tpu.matmul %3, %2, %cst {dimension_numbers = #tpu.dot_dimension_numbers<[1], [0], [0], [1], [0, 0, 1, 1], [], []>} : vector<64x4xbf16>, vector<4x256xbf16>, vector<64x256xf32> -> vector<64x256xf32>
    %cst_4 = arith.constant dense<0xFF800000> : vector<64xf32>
    %5 = vector.multi_reduction <maximumf>, %4, %cst_4 [1] : vector<64x256xf32> to vector<64xf32>
    %6 = vector.shape_cast %5 : vector<64xf32> to vector<64x1xf32>
    %7 = vector.broadcast %6 : vector<64x1xf32> to vector<64x256xf32>
    %8 = arith.subf %4, %7 : vector<64x256xf32>
    %9 = math.exp %8 : vector<64x256xf32>
    %cst_5 = arith.constant dense<0.000000e+00> : vector<64xf32>
    %10 = vector.multi_reduction <add>, %9, %cst_5 [1] : vector<64x256xf32> to vector<64xf32>
    %11 = vector.shape_cast %10 : vector<64xf32> to vector<64x1xf32>
    %12 = tpu.reciprocal %11 {approx = true} : vector<64x1xf32> -> vector<64x1xf32>
    %13 = vector.broadcast %12 : vector<64x1xf32> to vector<64x256xf32>
    %14 = arith.mulf %9, %13 : vector<64x256xf32>
    %c0_6 = arith.constant 0 : index
    %c0_7 = arith.constant 0 : index
    %15 = vector.load %arg3[%c0_6, %c0_7] : memref<4x64xbf16, #tpu.memory_space<vmem>>, vector<4x64xbf16>
    %16 = arith.truncf %14 : vector<64x256xf32> to vector<64x256xbf16>
    %cst_8 = arith.constant dense<0.000000e+00> : vector<4x256xf32>
    %17 = tpu.matmul %15, %16, %cst_8 {dimension_numbers = #tpu.dot_dimension_numbers<[1], [0], [0], [1], [0, 0, 1, 1], [], []>} : vector<4x64xbf16>, vector<64x256xbf16>, vector<4x256xf32> -> vector<4x256xf32>
    %c0_9 = arith.constant 0 : index
    %c0_10 = arith.constant 0 : index
    %c0_11 = arith.constant 0 : index
    %18 = vector.load %arg4[%c0_9, %c0_10, %c0_11] : memref<1x4x256xf32, #tpu.memory_space<vmem>>, vector<1x4x256xf32>
    %19 = vector.shape_cast %18 : vector<1x4x256xf32> to vector<4x256xf32>
    %20 = vector.shape_cast %17 : vector<4x256xf32> to vector<1x4x256xf32>
    tpu.vector_store %arg4[%c0_9, %c0_10, %c0_11], %20 {strides = array<i32>} : memref<1x4x256xf32, #tpu.memory_space<vmem>>, vector<1x4x256xf32>,
    return
  }
  func.func @transform_0(%arg0: i32) -> (i32, i32, i32) {
    %c0_i32 = arith.constant 0 : i32
    %c0_i32_0 = arith.constant 0 : i32
    %c0_i32_1 = arith.constant 0 : i32
    return %arg0, %c0_i32, %c0_i32_0 : i32, i32, i32
  }
  func.func @transform_1(%arg0: i32) -> (i32, i32) {
    %c0_i32 = arith.constant 0 : i32
    %c0_i32_0 = arith.constant 0 : i32
    %c0_i32_1 = arith.constant 0 : i32
    return %c0_i32, %c0_i32_0 : i32, i32
  }
  func.func @transform_2(%arg0: i32) -> (i32, i32) {
    %c0_i32 = arith.constant 0 : i32
    %c0_i32_0 = arith.constant 0 : i32
    %c0_i32_1 = arith.constant 0 : i32
    return %c0_i32, %c0_i32_0 : i32, i32
  }
  func.func @transform_3(%arg0: i32) -> (i32, i32, i32) {
    %c0_i32 = arith.constant 0 : i32
    %c0_i32_0 = arith.constant 0 : i32
    %c0_i32_1 = arith.constant 0 : i32
    return %arg0, %c0_i32, %c0_i32_0 : i32, i32, i32
  }
}

</mosaic_0001>

<bundles_post_ra>
// kernel: tpu_custom_call.1
= control target key start
LH: loop header
LB: loop body
LE: loop exit
PB: predicated region body
PF: predicated region fallthrough
CT: control target
= control target key end

     0   :  { %8 = vsyncpa [#allocation3], 0  ;;  %s904_s0 = inlined_call_operand.vmem [shape: f32[2,4,256], index: 0, kind: input, shape index: {}]   ;;  %s905_s1 = inlined_call_operand.vmem [shape: bf16[64,4], index: 1, kind: input, shape index: {}]   ;;  %s906_s2 = inlined_call_operand.vmem [shape: bf16[4,64], index: 2, kind: input, shape index: {}]   ;;  %s907_s3 = inlined_call_operand.hbm [shape: f32[2,4,256], index: 3, kind: output, shape index: {}]  }
   0x1   :  { %10 = vsyncpa [#allocation3 + $0x1], 0  ;;  %s753_s12 = smov 0   ;;  %s755_s13 = smov 0  }
   0x2   :  { %s757_s14 = smov 0   ;;  %s759_s15 = smov 0  }
   0x3 LB: > { %s774_s16 = sadd.s32 4294967295, %s729_s15   ;;  %s550_s17 = sadd.s32 4294967294, %s729_s15   ;;  %s729_s15 = sphi %s759_s15, %s913_s15   ;;  %s725_s14 = sphi %s757_s14, %s912_s14   ;;  %s721_s13 = sphi %s755_s13, %s911_s13   ;;  %s717_s12 = sphi %s753_s12, %s910_s12  }
   0x4   : > { %s778_s18 = sadd.s32 1, %s729_s15   ;;  %s91_s19 = sadd.s32 1, %s725_s14 }
   0x5   : > { %s88_s20 = ssub.s32 %s729_s15, %s778_s18  ;;  %p101_p0 = scmp.ne.s32.totalorder %s725_s14, %s721_s13 }
   0x6   : > { %p89_p1 = scmp.eq.s32.totalorder %s88_s20, 0  ;;  %p102_p2 = scmp.eq.s32.totalorder %s774_s16, 1 }
   0x7   : > { %p107_p3 = scmp.ne.s32.totalorder %s721_s13, %s717_s12  ;;  %p108_p4 = scmp.eq.s32.totalorder %s550_s17, 1 }
   0x8   : > { %s789_s21 = scalar_select %p89_p1, %s725_s14, %s91_s19  }
   0x9   : > { %p791_p5 = por %p102_p2, %p101_p0  ;;  %p795_p6 = por %p108_p4, %p107_p3 }
   0xa   : > { %p553_p7 = scmp.ge.s32.totalorder %s729_s15, 1  ;;  %p140_p8 = scmp.lt.s32.totalorder %s729_s15, 3 }
   0xc   : > { %p141_p9 = pnand %p553_p7, %p140_p8 }
   0xd   : > { %p164_p10 = scmp.lt.s32.totalorder (!%p141_p9), %s774_s16, 1  ;;  %v731_v0 = vmov (!%p141_p9), 0   ;;  %vm217_vm0 = vcmask (!%p141_p9), 1041408   ;;  %v615_v6 = vld [vmem:[%s905_s1] sm:$0xff] (!%p141_p9)   ;;  %vm204_vm1 = vcmask (!%p141_p9), 31744   ;;  %v616_v7 = vld [vmem:[%s905_s1 + $0x8] sm:$0xff] (!%p141_p9)  }
   0xe   : > { %144 = sbr.rel (%p141_p9) target bundleno = 825 (0x339), region = 32  ;;  %256 = vmatprep.mubr.bf16.mxu0 (!%p141_p9), %v731_v0  ;;  %462 = vmatprep.mubr.bf16.mxu1 (!%p141_p9), %v731_v0  ;;  %v617_v8 = vld [vmem:[%s905_s1 + $0x10] sm:$0xff] (!%p141_p9)   ;;  %v618_v9 = vld [vmem:[%s905_s1 + $0x18] sm:$0xff] (!%p141_p9)   ;;  %vm426_vm2 = vcmask (!%p141_p9), 523264   ;;  %s161_s17 = sand.u32 (!%p141_p9), 1, %s721_s13  }
   0xf   : > { %s554_s19 = sshll.u32 (!%p141_p9), %s161_s17, 3  ;;  %s573_s20 = sshll.u32 (!%p141_p9), %s774_s16, 7 }
  0x10   : > { %s477_s29 = scalar_lea.sflag (!%p141_p9), [#allocation3], %s161_s17  ;;  %s732_s30 = smov (!%p141_p9), [#allocation2]  }
  0x11   : > { %s671_s4 = sshll.u32 (!%p141_p9), %s732_s30, 4  ;;  %s672_s4 = int_to_ptr.vmem [resolvable:$false] %s671_s4 }
  0x12   : > { %s673_s5 = scalar_lea.vmem (!%p141_p9), %s672_s4, 256 }
  0x15   : > { %s165_s24 = scalar_select %p164_p10, %s774_s16, 1 }
  0x17   : > { %s572_s25 = sshll.u32 %s165_s24, 3  ;;  %s163_s24 = scalar_lea.vmem [#allocation2], %s554_s19 }
  0x18   : > { %s168_s28 = scalar_lea.vmem %s904_s0, %s572_s25  ;;  %s491_s25 = sshll.u32 %s163_s24, 4  ;;  %s864_s25 = int_to_ptr.vmem [resolvable:$true] %s491_s25 }
  0x19   : > { %v170_v1 = vld [vmem:[%s168_s28] sm:$0xff]  ;;  %s862_s28 = scalar_lea.hbm %s907_s3, %s573_s20  ;;  %s667_s16 = scalar_lea.vmem %s864_s25, 128 }
  0x1a   : > { %v172_v2 = vcombine.high %v170_v1, %v170_v1  ;;  %v174_v3 = vpack.c.bf16 %v170_v1, %v170_v1  ;;  %p668_p11 = scmp.ne.s32.totalorder %s864_s25, %s667_s16  ;;  %p674_p0 = scmp.lt.s32.totalorder %s864_s25, %s672_s4 }
  0x1b   : > { %p675_p1 = scmp.lt.s32.totalorder %s673_s5, %s667_s16 }
  0x1c   : > { %v175_v4 = vpack.c.bf16 %v172_v2, %v172_v2  ;;  %v219_v5 = vsel %vm217_vm0, %v174_v3, 0  ;;  %p669_p12 = pnand %p668_p11, %p791_p5 }
  0x1d   : > { %p676_p2 = por %p675_p1, %p674_p0 }
  0x1e   : > { %561 = vmatprep.subr.msk.bf16.mxu0 %vm217_vm0, %v175_v4  ;;  %p670_p13 = pneg %p669_p12 }
  0x1f   : > { %225 = vmatpush1.bf16.msra.mxu0 %v219_v5 }
  0x20   : > { %p677_p3 = pnand %p676_p2, %p670_p13 }
  0x22   : > { %562 = vmatmul.mubr.msk.bf16.vlgmr.msra.gmra.mrb[0].mxu0 %vm204_vm1, %v615_v6 }
  0x23   : > { %266 = vmatprep.mubr.bf16.mxu0 %v731_v0 }
  0x2a   : > { %563 = vmatmul.mubr.msk.bf16.gmra.mrb[4].mxu0 %vm204_vm1, %v616_v7 }
  0x2b   : > { %276 = vmatprep.mubr.bf16.mxu0 %v731_v0 }
  0x32   : > { %564 = vmatmul.mubr.msk.bf16.gmra.mrb[8].mxu0 %vm204_vm1, %v617_v8 }
  0x33   : > { %286 = vmatprep.mubr.bf16.mxu0 %v731_v0 }
  0x3a   : > { %565 = vmatmul.mubr.msk.bf16.gmra.mrb[12].mxu0 %vm204_vm1, %v618_v9 }
  0xf5   : > { %v258_v10 = vpop.f32.mrb[0].mxu0 }
  0xf6   : > { %v260_v11 = vpop.f32.mrb[1].mxu0 }
  0xf7   : > { %v262_v12 = vpop.f32.mrb[2].mxu0  ;;  %v297_v13 = vmax.f32 %v258_v10, %v260_v11 }
  0xf8   : > { %v264_v14 = vpop.f32.mrb[3].mxu0 }
  0xf9   : > { %298 = vmax.xlane.f32.xlu0 %v297_v13  ;;  %v300_v15 = vmax.f32 %v262_v12, %v264_v14 }
  0xfd   : > { %301 = vmax.xlane.f32.xlu0 %v300_v15  ;;  %v268_v16 = vpop.f32.mrb[4].mxu0 }
  0xfe   : > { %v270_v17 = vpop.f32.mrb[5].mxu0 }
  0xff   : > { %v272_v18 = vpop.f32.mrb[6].mxu0  ;;  %v303_v19 = vmax.f32 %v268_v16, %v270_v17 }
 0x100   : > { %v274_v20 = vpop.f32.mrb[7].mxu0 }
 0x101   : > { %304 = vmax.xlane.f32.xlu1 %v303_v19  ;;  %v306_v21 = vmax.f32 %v272_v18, %v274_v20 }
 0x105   : > { %307 = vmax.xlane.f32.xlu1 %v306_v21  ;;  %v278_v22 = vpop.f32.mrb[8].mxu0 }
 0x106   : > { %v280_v23 = vpop.f32.mrb[9].mxu0 }
 0x107   : > { %v282_v24 = vpop.f32.mrb[10].mxu0  ;;  %v309_v25 = vmax.f32 %v278_v22, %v280_v23 }
 0x108   : > { %v284_v26 = vpop.f32.mrb[11].mxu0 }
 0x109   : > { %310 = vmax.xlane.f32.xlu0 %v309_v25  ;;  %v312_v27 = vmax.f32 %v282_v24, %v284_v26 }
 0x10b   : > { %313 = vmax.xlane.f32.xlu1 %v312_v27 }
 0x10d   : > { %v818_v28 = vpop.f32.mrb[12].mxu0 }
 0x10e   : > { %v820_v29 = vpop.f32.mrb[13].mxu0 }
 0x10f   : > { %v822_v30 = vpop.f32.mrb[14].mxu0  ;;  %v315_v31 = vmax.f32 %v818_v28, %v820_v29 }
 0x110   : > { %v826_v32 = vpop.f32.mrb[15].mxu0 }
 0x111   : > { %v318_v33 = vmax.f32 %v822_v30, %v826_v32  ;;  %316 = vmax.xlane.f32.xlu0 %v315_v31 }
 0x113   : > { %319 = vmax.xlane.f32.xlu1 %v318_v33 }
 0x186   : > { %v299_v34 = vpop.xlane.xlu0 %298 }
 0x187   : > { %v321_v35 = vsub.f32 %v258_v10, %v299_v34  ;;  %v322_v36 = vsub.f32 %v260_v11, %v299_v34 }
 0x189   : > { %v337_v37 = vmul.f32 1.442695, %v321_v35  ;;  %v339_v38 = vmul.f32 1.442695, %v322_v36 }
 0x18a   : > { %v302_v39 = vpop.xlane.xlu0 %301 }
 0x18b   : > { %619 = vpow2.f32 %v337_v37  ;;  %v323_v40 = vsub.f32 %v262_v12, %v302_v39  ;;  %v324_v41 = vsub.f32 %v264_v14, %v302_v39 }
 0x18c   : > { %621 = vpow2.f32 %v339_v38 }
 0x18d   : > { %v341_v42 = vmul.f32 1.442695, %v323_v40  ;;  %v343_v43 = vmul.f32 1.442695, %v324_v41 }
 0x18e   : > { %v305_v44 = vpop.xlane.xlu1 %304 }
 0x18f   : > { %623 = vpow2.f32 %v341_v42  ;;  %v325_v45 = vsub.f32 %v268_v16, %v305_v44  ;;  %v326_v46 = vsub.f32 %v270_v17, %v305_v44 }
 0x190   : > { %625 = vpow2.f32 %v343_v43 }
 0x191   : > { %v345_v47 = vmul.f32 1.442695, %v325_v45  ;;  %v347_v48 = vmul.f32 1.442695, %v326_v46 }
 0x192   : > { %v308_v49 = vpop.xlane.xlu1 %307 }
 0x193   : > { %627 = vpow2.f32 %v345_v47  ;;  %v327_v50 = vsub.f32 %v272_v18, %v308_v49  ;;  %v328_v51 = vsub.f32 %v274_v20, %v308_v49 }
 0x194   : > { %629 = vpow2.f32 %v347_v48 }
 0x195   : > { %v830_v52 = vpop.eup %619  ;;  %v349_v53 = vmul.f32 1.442695, %v327_v50  ;;  %v351_v54 = vmul.f32 1.442695, %v328_v51 }
 0x196   : > { %v832_v55 = vpop.eup %621  ;;  %v311_v56 = vpop.xlane.xlu0 %310 }
 0x197   : > { %631 = vpow2.f32 %v349_v53  ;;  %v329_v57 = vsub.f32 %v278_v22, %v311_v56  ;;  %v330_v58 = vsub.f32 %v280_v23, %v311_v56  ;;  %v369_v59 = vadd.f32 %v832_v55, %v830_v52 }
 0x198   : > { %633 = vpow2.f32 %v351_v54  ;;  %v314_v60 = vpop.xlane.xlu1 %313 }
 0x199   : > { %v836_v61 = vpop.eup %623  ;;  %v353_v62 = vmul.f32 1.442695, %v329_v57  ;;  %v355_v63 = vmul.f32 1.442695, %v330_v58  ;;  %v331_v0 = vsub.f32 %v282_v24, %v314_v60  ;;  %v332_v1 = vsub.f32 %v284_v26, %v314_v60  ;;  %370 = vadd.xlane.f32.xlu0 %v369_v59 }
 0x19a   : > { %v626_v2 = vpop.eup %625 }
 0x19b   : > { %635 = vpow2.f32 %v353_v62  ;;  %v357_v3 = vmul.f32 1.442695, %v331_v0  ;;  %v359_v4 = vmul.f32 1.442695, %v332_v1  ;;  %v372_v5 = vadd.f32 %v626_v2, %v836_v61 }
 0x19c   : > { %637 = vpow2.f32 %v355_v63 }
 0x19d   : > { %v839_v6 = vpop.eup %627  ;;  %639 = vpow2.f32 %v357_v3  ;;  %373 = vadd.xlane.f32.xlu1 %v372_v5 }
 0x19e   : > { %v841_v7 = vpop.eup %629  ;;  %641 = vpow2.f32 %v359_v4  ;;  %v317_v8 = vpop.xlane.xlu0 %316 }
 0x19f   : > { %v333_v9 = vsub.f32 %v818_v28, %v317_v8  ;;  %v334_v10 = vsub.f32 %v820_v29, %v317_v8  ;;  %v375_v11 = vadd.f32 %v841_v7, %v839_v6 }
 0x1a0   : > { %v320_v12 = vpop.xlane.xlu1 %319 }
 0x1a1   : > { %v632_v13 = vpop.eup %631  ;;  %v361_v14 = vmul.f32 1.442695, %v333_v9  ;;  %v363_v15 = vmul.f32 1.442695, %v334_v10  ;;  %376 = vadd.xlane.f32.xlu0 %v375_v11  ;;  %v335_v16 = vsub.f32 %v822_v30, %v320_v12  ;;  %v336_v17 = vsub.f32 %v826_v32, %v320_v12  ;;  %v417_v10 = vld [vmem:[%s906_s2] sm:$0x3] }
 0x1a2   : > { %v634_v18 = vpop.eup %633 }
 0x1a3   : > { %643 = vpow2.f32 %v361_v14  ;;  %v365_v19 = vmul.f32 1.442695, %v335_v16  ;;  %v367_v20 = vmul.f32 1.442695, %v336_v17  ;;  %v378_v21 = vadd.f32 %v634_v18, %v632_v13 }
 0x1a4   : > { %645 = vpow2.f32 %v363_v15 }
 0x1a5   : > { %v636_v22 = vpop.eup %635  ;;  %647 = vpow2.f32 %v365_v19  ;;  %379 = vadd.xlane.f32.xlu1 %v378_v21 }
 0x1a6   : > { %v638_v23 = vpop.eup %637  ;;  %649 = vpow2.f32 %v367_v20 }
 0x1a7   : > { %v640_v24 = vpop.eup %639  ;;  %v381_v25 = vadd.f32 %v638_v23, %v636_v22 }
 0x1a8   : > { %v642_v26 = vpop.eup %641 }
 0x1a9   : > { %382 = vadd.xlane.f32.xlu0 %v381_v25  ;;  %v384_v27 = vadd.f32 %v642_v26, %v640_v24 }
 0x1ab   : > { %385 = vadd.xlane.f32.xlu1 %v384_v27 }
 0x1ad   : > { %v644_v28 = vpop.eup %643 }
 0x1ae   : > { %v646_v29 = vpop.eup %645 }
 0x1af   : > { %v648_v30 = vpop.eup %647  ;;  %v387_v31 = vadd.f32 %v646_v29, %v644_v28 }
 0x1b0   : > { %v650_v32 = vpop.eup %649 }
 0x1b1   : > { %388 = vadd.xlane.f32.xlu0 %v387_v31  ;;  %v390_v33 = vadd.f32 %v650_v32, %v648_v30 }
 0x1b3   : > { %391 = vadd.xlane.f32.xlu1 %v390_v33 }
 0x226   : > { %v371_v34 = vpop.xlane.xlu0 %370 }
 0x227   : > { %651 = vrcp.f32 %v371_v34 }
 0x22a   : > { %v374_v35 = vpop.xlane.xlu1 %373 }
 0x22b   : > { %653 = vrcp.f32 %v374_v35 }
 0x22e   : > { %v377_v36 = vpop.xlane.xlu0 %376 }
 0x22f   : > { %655 = vrcp.f32 %v377_v36 }
 0x231   : > { %v652_v38 = vpop.eup %651 }
 0x232   : > { %v380_v37 = vpop.xlane.xlu1 %379  ;;  %v402_v41 = vmul.f32 %v652_v38, %v832_v55  ;;  %v401_v43 = vmul.f32 %v652_v38, %v830_v52 }
 0x233   : > { %657 = vrcp.f32 %v380_v37 }
 0x235   : > { %v654_v39 = vpop.eup %653 }
 0x236   : > { %v383_v40 = vpop.xlane.xlu0 %382  ;;  %v404_v42 = vmul.f32 %v654_v39, %v626_v2  ;;  %v403_v44 = vmul.f32 %v654_v39, %v836_v61 }
 0x237   : > { %659 = vrcp.f32 %v383_v40 }
 0x238   : > { %v386_v45 = vpop.xlane.xlu1 %385  ;;  %v419_v46 = vpack.c.bf16 %v404_v42, %v402_v41  ;;  %v418_v47 = vpack.c.bf16 %v403_v44, %v401_v43 }
 0x239   : > { %661 = vrcp.f32 %v386_v45  ;;  %v656_v48 = vpop.eup %655 }
 0x23a   : > { %430 = vmatprep.subr.bf16.mxu1 %v419_v46  ;;  %v406_v51 = vmul.f32 %v656_v48, %v841_v7  ;;  %v405_v54 = vmul.f32 %v656_v48, %v839_v6 }
 0x23b   : > { %431 = vmatpush1.bf16.msra.mxu1 %v418_v47 }
 0x23d   : > { %v658_v49 = vpop.eup %657 }
 0x23e   : > { %v389_v50 = vpop.xlane.xlu0 %388  ;;  %v408_v53 = vmul.f32 %v658_v49, %v634_v18  ;;  %v407_v55 = vmul.f32 %v658_v49, %v632_v13 }
 0x23f   : > { %663 = vrcp.f32 %v389_v50 }
 0x240   : > { %v392_v52 = vpop.xlane.xlu1 %391  ;;  %v421_v56 = vpack.c.bf16 %v408_v53, %v406_v51  ;;  %v420_v57 = vpack.c.bf16 %v407_v55, %v405_v54 }
 0x241   : > { %v660_v58 = vpop.eup %659  ;;  %665 = vrcp.f32 %v392_v52 }
 0x242   : > { %432 = vmatprep.subr.bf16.mxu1 %v421_v56  ;;  %v410_v60 = vmul.f32 %v660_v58, %v638_v23  ;;  %v409_v62 = vmul.f32 %v660_v58, %v636_v22 }
 0x243   : > { %v662_v59 = vpop.eup %661  ;;  %433 = vmatpush1.bf16.msra.mxu1 %v420_v57 }
 0x244   : > { %v412_v61 = vmul.f32 %v662_v59, %v642_v26  ;;  %v411_v63 = vmul.f32 %v662_v59, %v640_v24 }
 0x246   : > { %v423_v0 = vpack.c.bf16 %v412_v61, %v410_v60  ;;  %v422_v1 = vpack.c.bf16 %v411_v63, %v409_v62 }
 0x248   : > { %434 = vmatprep.subr.bf16.mxu1 %v423_v0 }
 0x249   : > { %v664_v2 = vpop.eup %663  ;;  %435 = vmatpush1.bf16.msra.mxu1 %v422_v1 }
 0x24a   : > { %v414_v4 = vmul.f32 %v664_v2, %v646_v29  ;;  %v413_v6 = vmul.f32 %v664_v2, %v644_v28 }
 0x24b   : > { %v666_v3 = vpop.eup %665 }
 0x24c   : > { %v416_v5 = vmul.f32 %v666_v3, %v650_v32  ;;  %v415_v7 = vmul.f32 %v666_v3, %v648_v30 }
 0x24e   : > { %v425_v8 = vpack.c.bf16 %v416_v5, %v414_v4  ;;  %v424_v9 = vpack.c.bf16 %v415_v7, %v413_v6 }
 0x250   : > { %436 = vmatprep.subr.bf16.mxu1 %v425_v8 }
 0x251   : > { %437 = vmatpush1.bf16.msra.mxu1 %v424_v9 }
 0x254   : > { %566 = vmatmul.mubr.msk.bf16.vlgmr.msra.gmra.mrb[0].mxu1 %vm426_vm2, %v417_v10 }
 0x327   : > { %v464_v11 = vpop.f32.mrb[0].mxu1 }
 0x328   : > { %v466_v12 = vpop.f32.mrb[1].mxu1 }
 0x329   : > { %v473_v13 = vcombine.low %v464_v11, %v466_v12  ;;  %v468_v14 = vpop.f32.mrb[2].mxu1 }
 0x32a   : > { %v469_v15 = vpop.f32.mrb[3].mxu1 }
 0x32b   : > { %475 = vst [vmem:[%s163_s24] sm:$0xff] %v473_v13 }
 0x32c   : > { %680 = shalt.err (!%p677_p3)
}
 0x32d   : > { %s681_s6 = scalar_lea.hbm %s862_s28, 128  ;;  %s685_s9 = scalar_lea.hbm %s907_s3, 256 }
 0x32e   : > { %p682_p4 = scmp.ne.s32.totalorder %s862_s28, %s681_s6  ;;  %p686_p9 = scmp.lt.u32.totalorder %s862_s28, %s907_s3 }
 0x32f   : > { %p687_p10 = scmp.lt.u32.totalorder %s685_s9, %s681_s6  ;;  %p689_p12 = scmp.lt.u32.totalorder %s681_s6, %s862_s28 }
 0x330   : > { %p683_p7 = pnand %p682_p4, %p791_p5 }
 0x331   : > { %p688_p11 = por %p687_p10, %p686_p9 }
 0x332   : > { %p684_p8 = pneg %p683_p7 }
 0x333   : > { %p690_p13 = por %p689_p12, %p688_p11 }
 0x335   : > { %p691_p0 = pnand %p690_p13, %p684_p8 }
 0x337   : > { %694 = shalt.err (!%p691_p0)
}
 0x338   : > { %574 = dma.vmem_to_hbm [thread:$0]  (%p791_p5), %s864_s25, 128, %s862_s28, %s477_s29  }
 0x339 PF: > { %p580_p1 = scmp.ge.s32.totalorder %s729_s15, 2  ;;  %s503_s17 = sand.u32 1, %s717_s12  }
 0x33a   : > { %s504_s19 = scalar_lea.sflag [#allocation3], %s503_s17 }
 0x33b   : > { %p577_p2 = pnand %p580_p1, %p795_p6 }
 0x33d   : > { %712 = dma.done.wait (!%p577_p2), %s504_s19, 128  }
 0x33e   : > { %714 = vsyncadd (!%p577_p2), %s504_s19, 4294967168  ;;  %p13_p3 = scmp.ge.s32.totalorder %s778_s18, 4   ;;  %s910_s12 = smov %s721_s13 }
 0x33f   : > { %s911_s13 = smov %s725_s14  ;;  %s912_s14 = smov %s789_s21 }
 0x340   : > { %s913_s15 = smov %s778_s18  ;;  %15 = sbr.rel (!%p13_p3) target bundleno = 3 (0x3), region = 67 }
 0x347   :  { %509 = vsyncpa [#allocation3], 1 }
 0x348   :  { %511 = vsyncpa [#allocation3 + $0x1], 1 }

</bundles_post_ra>
